<compile_context>
chip_gen: v7x
topology: tpu7x:2x2x1
jax: 0.10.0
libtpu: 0.0.40
codegen_flags: <defaults>
</compile_context>

<pallas_src>
import jax
import jax.numpy as jnp
from jax import lax
from jax.experimental import pallas as pl
from jax.experimental.pallas import tpu as pltpu

LANE = 128


def _round_up(x, m):
    return (x + m - 1) // m * m


def _vmem_budget_bytes():
    """Per-generation VMEM limit (~70% of capacity, capped), conservative fallback."""
    cap = 64 * 1024 * 1024  # v7x per-TC physical VMEM (smallest of the three gens)
    try:
        cap = int(getattr(pltpu.get_tpu_info(), "vmem_capacity_bytes", cap))
    except Exception:
        pass
    return min(int(0.70 * cap), 100 * 1024 * 1024)


def _pick_row_tile(n_pad, fh_pad, budget, cap_tm=512):
    """Largest row tile (<=512) whose fused-aggregation working set fits the budget."""
    tm = cap_tm
    while tm > 128:
        need = (2 * tm * n_pad * 2          # A row slab, double-buffered, bf16
                + 2 * n_pad * fh_pad * 2    # resident XW (double-buffered), bf16
                + 6 * tm * fh_pad * 2)      # W_next + two bf16 outputs + slack
        if n_pad % tm == 0 and need <= int(0.8 * budget):
            break
        tm //= 2
    return tm


# ---------------------------------------------------------------------------
# Pallas kernels
# ---------------------------------------------------------------------------
def _xw_kernel(x_ref, w_ref, o_ref):
    """Layer-0 feature transform XW = X @ W (bf16 in, f32 MXU acc, bf16 out)."""
    o_ref[...] = jnp.dot(
        x_ref[...], w_ref[...], preferred_element_type=jnp.float32
    ).astype(jnp.bfloat16)


def _agg_fused_kernel(a_ref, xw_ref, b_ref, wn_ref, h_ref, xwn_ref):
    """One GCN layer for a row slab, fused with the NEXT layer's feature transform.

    h   = relu(A_slab @ XW + b)        (XW is VMEM-resident, full-K dot, f32 acc)
    out = (h.bf16, (h @ W_next).bf16)  -> next layer never pays a separate X@W launch.
    """
    acc = jnp.dot(a_ref[...], xw_ref[...], preferred_element_type=jnp.float32)
    h = jnp.maximum(acc + b_ref[...], 0.0)
    h_bf = h.astype(jnp.bfloat16)
    h_ref[...] = h_bf
    xwn_ref[...] = jnp.dot(
        h_bf, wn_ref[...], preferred_element_type=jnp.float32
    ).astype(jnp.bfloat16)


def _make_final_kernel(num_prev, num_classes):
    """Last GCN layer fused with the jumping-knowledge readout + softmax.

    logits = concat(h_0..h_{L-1}) @ W_r + b_r == sum_l h_l @ W_r[l]  (row-split W_r),
    so the concatenated hidden state is never materialized.
    """

    def kernel(a_ref, xw_ref, b_ref, wr_ref, br_ref, *rest):
        prev_refs = rest[:num_prev]
        o_ref = rest[num_prev]

        acc = jnp.dot(a_ref[...], xw_ref[...], preferred_element_type=jnp.float32)
        h_last = jnp.maximum(acc + b_ref[...], 0.0)

        logits = jnp.dot(
            h_last.astype(jnp.bfloat16), wr_ref[num_prev],
            preferred_element_type=jnp.float32,
        )
        for l in range(num_prev):
            logits = logits + jnp.dot(
                prev_refs[l][...], wr_ref[l], preferred_element_type=jnp.float32
            )
        logits = logits + br_ref[...]

        # Mask padded class lanes (logits stay f32 on this path) so softmax normalizes
        # over real classes only.
        col = lax.broadcasted_iota(jnp.int32, logits.shape, 1)
        logits = jnp.where(col < num_classes, logits, -1e30)
        m = jnp.max(logits, axis=1, keepdims=True)
        e = jnp.exp(logits - m)
        denom = jnp.sum(e, axis=1, keepdims=True)
        o_ref[...] = e / denom  # exact normalization (once per row tile; negligible)

    return kernel


# ---------------------------------------------------------------------------
# pallas_call wrappers
# ---------------------------------------------------------------------------
def linear_xw(x_bf, w_bf, *, tm, vmem_limit):
    n_pad, f_in = x_bf.shape
    f_out = w_bf.shape[1]
    return pl.pallas_call(
        _xw_kernel,
        out_shape=jax.ShapeDtypeStruct((n_pad, f_out), jnp.bfloat16),
        grid_spec=pltpu.PrefetchScalarGridSpec(
            num_scalar_prefetch=0,
            grid=(n_pad // tm,),
            in_specs=[
                pl.BlockSpec((tm, f_in), lambda i: (i, 0)),
                pl.BlockSpec((f_in, f_out), lambda i: (0, 0)),
            ],
            out_specs=pl.BlockSpec((tm, f_out), lambda i: (i, 0)),
        ),
        compiler_params=pltpu.CompilerParams(
            dimension_semantics=("parallel",),
            vmem_limit_bytes=vmem_limit,
        ),
        cost_estimate=pl.CostEstimate(
            flops=2 * n_pad * f_in * f_out,
            transcendentals=0,
            bytes_accessed=2 * n_pad * f_in + 2 * f_in * f_out + 2 * n_pad * f_out,
        ),
    )(x_bf, w_bf)


def gcn_aggregate_fused(a_pad, xw, b_pad, w_next, *, tm, vmem_limit):
    n_pad = a_pad.shape[0]
    f_out = xw.shape[1]
    f_next = w_next.shape[1]
    return pl.pallas_call(
        _agg_fused_kernel,
        out_shape=(
            jax.ShapeDtypeStruct((n_pad, f_out), jnp.bfloat16),   # h_l   (for JK)
            jax.ShapeDtypeStruct((n_pad, f_next), jnp.bfloat16),  # xw_{l+1}
        ),
        grid_spec=pltpu.PrefetchScalarGridSpec(
            num_scalar_prefetch=0,
            grid=(n_pad // tm,),
            in_specs=[
                pl.BlockSpec((tm, n_pad), lambda i: (i, 0)),      # A_hat row slab (bf16)
                pl.BlockSpec((n_pad, f_out), lambda i: (0, 0)),   # resident XW (bf16)
                pl.BlockSpec((1, f_out), lambda i: (0, 0)),       # bias (f32)
                pl.BlockSpec((f_out, f_next), lambda i: (0, 0)),  # W_{l+1} (bf16)
            ],
            out_specs=[
                pl.BlockSpec((tm, f_out), lambda i: (i, 0)),
                pl.BlockSpec((tm, f_next), lambda i: (i, 0)),
            ],
        ),
        compiler_params=pltpu.CompilerParams(
            dimension_semantics=("parallel",),
            vmem_limit_bytes=vmem_limit,
        ),
        cost_estimate=pl.CostEstimate(
            flops=2 * n_pad * n_pad * f_out + 2 * n_pad * f_out * f_next,
            transcendentals=0,
            bytes_accessed=2 * n_pad * n_pad
            + 2 * n_pad * f_out                        # resident XW read (once)
            + 2 * n_pad * f_out + 2 * n_pad * f_next,  # bf16 outputs
        ),
    )(a_pad, xw, b_pad, w_next)


def gcn_final_readout(a_pad, xw, b_pad, wr_stacked, br_pad, prev_hidden,
                      num_classes, *, tm, vmem_limit):
    n_pad = a_pad.shape[0]
    f_out = xw.shape[1]
    n_layers, fh_pad, c_pad = wr_stacked.shape
    num_prev = len(prev_hidden)

    in_specs = [
        pl.BlockSpec((tm, n_pad), lambda i: (i, 0)),                    # A_hat row slab
        pl.BlockSpec((n_pad, f_out), lambda i: (0, 0)),                 # resident XW
        pl.BlockSpec((1, f_out), lambda i: (0, 0)),                     # last-layer bias
        pl.BlockSpec((n_layers, fh_pad, c_pad), lambda i: (0, 0, 0)),   # row-split W_r
        pl.BlockSpec((1, c_pad), lambda i: (0, 0)),                     # readout bias
    ] + [pl.BlockSpec((tm, fh_pad), lambda i: (i, 0)) for _ in range(num_prev)]

    return pl.pallas_call(
        _make_final_kernel(num_prev, num_classes),
        out_shape=jax.ShapeDtypeStruct((n_pad, c_pad), jnp.float32),
        grid_spec=pltpu.PrefetchScalarGridSpec(
            num_scalar_prefetch=0,
            grid=(n_pad // tm,),
            in_specs=in_specs,
            out_specs=pl.BlockSpec((tm, c_pad), lambda i: (i, 0)),
        ),
        compiler_params=pltpu.CompilerParams(
            dimension_semantics=("parallel",),
            vmem_limit_bytes=vmem_limit,
        ),
        cost_estimate=pl.CostEstimate(
            flops=2 * n_pad * n_pad * f_out + 2 * n_pad * fh_pad * c_pad * n_layers,
            transcendentals=n_pad * c_pad,
            bytes_accessed=2 * n_pad * n_pad
            + 2 * n_pad * fh_pad * (num_prev + 1)
            + 4 * n_pad * c_pad
            + 2 * n_layers * fh_pad * c_pad,
        ),
    )(a_pad, xw, b_pad, wr_stacked, br_pad, *prev_hidden)


# ---------------------------------------------------------------------------
# Graph glue: dense normalized adjacency A_hat = D^-1/2 (A + I) D^-1/2, built directly
# at the padded size, normalized + cast to bf16 in one fused expression.
# (Matches PyG GCNConv default add_self_loops / normalize; duplicate edges accumulate.)
# ---------------------------------------------------------------------------
def build_normalized_adjacency_padded(edge_index, n, n_pad):
    src = edge_index[0]
    dst = edge_index[1]
    a = jnp.zeros((n_pad, n_pad), jnp.float32)
    a = a.at[dst, src].add(1.0)                      # message s -> t at A[t, s]
    diag = jnp.arange(n)
    a = a.at[diag, diag].add(1.0)                    # self loops (real nodes only)
    deg = jnp.sum(a, axis=1)
    dinv = jnp.where(deg > 0.0, 1.0 / jnp.sqrt(deg), 0.0)
    return ((dinv[:, None] * a) * dinv[None, :]).astype(jnp.bfloat16)


# ---------------------------------------------------------------------------
# Full model forward
# ---------------------------------------------------------------------------
def gcn_jumping_knowledge_forward(x, edge_index, params):
    n, f_in = x.shape
    gcn_params = params["gcn"]
    w_r, b_r = params["readout"]
    num_layers = len(gcn_params)
    num_classes = w_r.shape[1]

    vmem_limit = _vmem_budget_bytes()

    n_pad = _round_up(n, 512)                 # multiple of every candidate row tile
    f_in_pad = _round_up(f_in, LANE)
    hid_dims = [w.shape[1] for (w, _) in gcn_params]
    fh_pad = _round_up(max(hid_dims), LANE)
    c_pad = _round_up(num_classes, LANE)

    tm = _pick_row_tile(n_pad, fh_pad, vmem_limit)   # aggregation row tile
    tm_final = min(256, tm)                          # cap: softmax epilogue vreg pressure

    a_pad = build_normalized_adjacency_padded(edge_index, n, n_pad)

    # Lane-dense bf16 node features.
    x_pad = jnp.zeros((n_pad, f_in_pad), jnp.bfloat16).at[:n, :f_in].set(
        x.astype(jnp.bfloat16))

    # Pad per-layer GCN weights (bf16) / biases (f32) to lane-dense feature dims.
    w_bf, b_f32 = [], []
    in_pad = f_in_pad
    for (w, b) in gcn_params:
        fi, fo = w.shape
        w_bf.append(
            jnp.zeros((in_pad, fh_pad), jnp.bfloat16).at[:fi, :fo].set(
                w.astype(jnp.bfloat16)))
        b_f32.append(jnp.zeros((1, fh_pad), jnp.float32).at[0, :fo].set(b))
        in_pad = fh_pad

    # Split readout weights row-wise per layer (JK concat == summed per-layer partials).
    wr_blocks = []
    off = 0
    for fo in hid_dims:
        blk = w_r[off:off + fo].astype(jnp.bfloat16)
        wr_blocks.append(
            jnp.zeros((fh_pad, c_pad), jnp.bfloat16).at[:fo, :num_classes].set(blk))
        off += fo
    wr_stacked = jnp.stack(wr_blocks, axis=0)          # [L, fh_pad, c_pad] bf16
    br_pad = jnp.zeros((1, c_pad), jnp.float32).at[0, :num_classes].set(b_r)

    # Layer-0 feature transform (the only standalone X@W launch).
    xw = linear_xw(x_pad, w_bf[0], tm=tm, vmem_limit=vmem_limit)

    hidden = []
    for l in range(num_layers - 1):
        h_l, xw = gcn_aggregate_fused(
            a_pad, xw, b_f32[l], w_bf[l + 1], tm=tm, vmem_limit=vmem_limit)
        hidden.append(h_l)

    probs = gcn_final_readout(
        a_pad, xw, b_f32[num_layers - 1], wr_stacked, br_pad, hidden, num_classes,
        tm=tm_final, vmem_limit=vmem_limit)
    return probs[:n, :num_classes]


# ---------------------------------------------------------------------------
# Pure-JAX reference mirroring the kernel's bf16 rounding points, for verification.
# ---------------------------------------------------------------------------
def _bf(v):
    return v.astype(jnp.bfloat16).astype(jnp.float32)


def reference_forward(x, edge_index, params):
    n = x.shape[0]
    src, dst = edge_index[0], edge_index[1]
    a = jnp.zeros((n, n), jnp.float32).at[dst, src].add(1.0) + jnp.eye(n, dtype=jnp.float32)
    deg = jnp.sum(a, axis=1)
    dinv = jnp.where(deg > 0.0, 1.0 / jnp.sqrt(deg), 0.0)
    a_bf = _bf((dinv[:, None] * a) * dinv[None, :])

    h_bf = _bf(x)
    hidden = []
    for (w, b) in params["gcn"]:
        xw = _bf(h_bf @ _bf(w))
        h = jnp.maximum(a_bf @ xw + b[None, :], 0.0)
        h_bf = _bf(h)
        hidden.append(h_bf)

    w_r, b_r = params["readout"]
    logits = jnp.asarray(b_r)[None, :]
    off = 0
    for l, h_l in enumerate(hidden):
        fo = params["gcn"][l][0].shape[1]
        logits = logits + h_l @ _bf(w_r[off:off + fo])
        off += fo
    return jax.nn.softmax(logits, axis=1)


# ---------------------------------------------------------------------------
# Deterministic parameter construction
# ---------------------------------------------------------------------------
def init_params(key, input_dim, hidden_dims, output_dim):
    params = {"gcn": [], "readout": None}
    dims = [input_dim] + list(hidden_dims)
    keys = jax.random.split(key, len(hidden_dims) + 1)
    for i in range(len(hidden_dims)):
        f_in, f_out = dims[i], dims[i + 1]
        kw, kb = jax.random.split(keys[i])
        scale = 1.0 / jnp.sqrt(jnp.float32(f_in))
        w = jax.random.uniform(kw, (f_in, f_out), jnp.float32, -scale, scale)
        b = jax.random.uniform(kb, (f_out,), jnp.float32, -scale, scale)
        params["gcn"].append((w, b))
    f_cat = hidden_dims[-1] * len(hidden_dims)
    kw, kb = jax.random.split(keys[-1])
    scale = 1.0 / jnp.sqrt(jnp.float32(f_cat))
    w_r = jax.random.uniform(kw, (f_cat, output_dim), jnp.float32, -scale, scale)
    b_r = jax.random.uniform(kb, (output_dim,), jnp.float32, -scale, scale)
    params["readout"] = (w_r, b_r)
    return params


if __name__ == "__main__":
    # Small synthetic graph that still exercises multiple row tiles:
    # N=1000 -> n_pad=1024 -> 2 row slabs at tm=512 (agg), 4 at tm=256 (final readout).
    N = 1000
    INPUT_DIM = 16
    HIDDEN_DIMS = [32, 32]
    OUTPUT_DIM = 7

    key = jax.random.PRNGKey(0)
    k_x, k_p = jax.random.split(key)

    x = jax.random.normal(k_x, (N, INPUT_DIM), dtype=jnp.float32)

    # Deterministic graph: bidirectional ring + bidirectional +7 chords.
    idx = jnp.arange(N, dtype=jnp.int32)
    nxt = (idx + 1) % N
    chord = (idx + 7) % N
    src = jnp.concatenate([idx, nxt, idx, chord])
    dst = jnp.concatenate([nxt, idx, chord, idx])
    edge_index = jnp.stack([src, dst], axis=0)

    params = init_params(k_p, INPUT_DIM, HIDDEN_DIMS, OUTPUT_DIM)

    out = gcn_jumping_knowledge_forward(x, edge_index, params)
    out = jax.block_until_ready(out)

    ref = reference_forward(x, edge_index, params)

    assert out.shape == (N, OUTPUT_DIM)
    # Exact softmax normalization: rows sum to ~1 tightly.
    assert jnp.allclose(jnp.sum(out, axis=1), 1.0, atol=1e-3)
    # Match the bf16-mirrored pure-JAX reference.
    assert jnp.max(jnp.abs(out - ref)) < 2e-2

    print("KERNEL_OK")
</pallas_src>

<mosaic_0001>
module attributes {stable_mosaic.version = 11 : i64} {
  func.func @_xw_kernel(%arg0: i32, %arg1: memref<512x128xbf16, #tpu.memory_space<vmem>>, %arg2: memref<128x128xbf16, #tpu.memory_space<vmem>>, %arg3: memref<512x128xbf16, #tpu.memory_space<vmem>>) attributes {dimension_semantics = [#tpu.dimension_semantics<parallel>], iteration_bounds = array<i64: 2>, scalar_prefetch = 0 : i64, scratch_operands = 0 : i64, tpu.core_type = #tpu.core_type<tc>, window_params = [{transform_indices = @transform_0, window_bounds = array<i64: 512, 128>}, {pipeline_mode = #tpu.pipeline_mode<synchronous>, transform_indices = @transform_1, window_bounds = array<i64: 128, 128>}, {transform_indices = @transform_2, window_bounds = array<i64: 512, 128>}]} {
    %c0 = arith.constant 0 : index
    %c0_0 = arith.constant 0 : index
    %0 = vector.load %arg1[%c0, %c0_0] : memref<512x128xbf16, #tpu.memory_space<vmem>>, vector<512x128xbf16>
    %c0_1 = arith.constant 0 : index
    %c0_2 = arith.constant 0 : index
    %1 = vector.load %arg2[%c0_1, %c0_2] : memref<128x128xbf16, #tpu.memory_space<vmem>>, vector<128x128xbf16>
    %cst = arith.constant dense<0.000000e+00> : vector<512x128xf32>
    %2 = tpu.matmul %0, %1, %cst {dimension_numbers = #tpu.dot_dimension_numbers<[1], [0], [0], [1], [0, 0, 1, 1], [], []>} : vector<512x128xbf16>, vector<128x128xbf16>, vector<512x128xf32> -> vector<512x128xf32>
    %3 = arith.truncf %2 : vector<512x128xf32> to vector<512x128xbf16>
    %c0_3 = arith.constant 0 : index
    %c0_4 = arith.constant 0 : index
    %4 = vector.load %arg3[%c0_3, %c0_4] : memref<512x128xbf16, #tpu.memory_space<vmem>>, vector<512x128xbf16>
    tpu.vector_store %arg3[%c0_3, %c0_4], %3 {strides = array<i32>} : memref<512x128xbf16, #tpu.memory_space<vmem>>, vector<512x128xbf16>,
    return
  }
  func.func @transform_0(%arg0: i32) -> (i32, i32) {
    %c0_i32 = arith.constant 0 : i32
    %c0_i32_0 = arith.constant 0 : i32
    return %arg0, %c0_i32 : i32, i32
  }
  func.func @transform_1(%arg0: i32) -> (i32, i32) {
    %c0_i32 = arith.constant 0 : i32
    %c0_i32_0 = arith.constant 0 : i32
    %c0_i32_1 = arith.constant 0 : i32
    return %c0_i32, %c0_i32_0 : i32, i32
  }
  func.func @transform_2(%arg0: i32) -> (i32, i32) {
    %c0_i32 = arith.constant 0 : i32
    %c0_i32_0 = arith.constant 0 : i32
    return %arg0, %c0_i32 : i32, i32
  }
}

</mosaic_0001>

<bundles_post_ra>
// kernel: tpu_custom_call.1
= control target key start
LH: loop header
LB: loop body
LE: loop exit
PB: predicated region body
PF: predicated region fallthrough
CT: control target
= control target key end

     0   :  { %7 = vsyncpa [#allocation3], 0  ;;  %s2252_s0 = inlined_call_operand.hbm [shape: bf16[1024,128], index: 0, kind: input, shape index: {}]   ;;  %s2253_s1 = inlined_call_operand.hbm [shape: bf16[128,128], index: 1, kind: input, shape index: {}]   ;;  %s2254_s2 = inlined_call_operand.hbm [shape: bf16[1024,128], index: 2, kind: output, shape index: {}]  }
   0x1   :  { %9 = vsyncpa [#allocation3 + $0x1], 0 }
   0x2   :  { %10 = vsyncpa [#allocation6], 0 }
   0x3   :  { %11 = vsyncpa [#allocation4], 0 }
   0x4   :  { %13 = vsyncpa [#allocation4 + $0x1], 0  ;;  %s1972_s9 = smov 0   ;;  %s1974_s10 = smov 0  }
   0x5   :  { %s1976_s11 = smov 0   ;;  %s1978_s12 = smov 0  }
   0x6 LB: > { %s1993_s13 = sadd.s32 4294967295, %s1948_s12   ;;  %s1206_s14 = sadd.s32 4294967294, %s1948_s12   ;;  %s1948_s12 = sphi %s1978_s12, %s2274_s12   ;;  %s1944_s11 = sphi %s1976_s11, %s2273_s11   ;;  %s1940_s10 = sphi %s1974_s10, %s2272_s10   ;;  %s1936_s9 = sphi %s1972_s9, %s2271_s9  }
   0x7   : > { %p39_p0 = scmp.ne.s32.totalorder %s1940_s10, %s1936_s9  ;;  %p2255_p1 = scmp.eq.s32.totalorder %s1993_s13, 0 }
   0x8   : > { %p90_p3 = scmp.eq.s32.totalorder %s1206_s14, 1  ;;  %p1207_p5 = scmp.ge.s32.totalorder %s1948_s12, 1 }
   0x9   : > { %p2002_p4 = por %p2255_p1, %p39_p0  ;;  %p97_p7 = scmp.lt.s32.totalorder %s1948_s12, 3 }
   0xa   : > { %p2007_p6 = por %p90_p3, %p39_p0  ;;  %s1950_s18 = smov [#allocation5]  }
   0xb   : > { %s2258_s15 = scalar_select %p2002_p4, 1, 0 }
   0xc   : > { %s2259_s16 = scalar_select %p2007_p6, 1, 0 }
   0xd   : > { %p2012_p8 = pnand %p1207_p5, %p97_p7  ;;  %s109_s19 = sshll.u32 %s1950_s18, 4  ;;  %s2016_s19 = int_to_ptr.vmem [resolvable:$true] %s109_s19 }
   0xe   : > { %s2028_s21 = sadd.s32 1, %s1948_s12   ;;  %s26_s22 = sadd.s32 1, %s1944_s11 }
   0xf   : > { %s2260_s17 = scalar_select %p2012_p8, 1, 0 }
  0x10   : > { %p1727_p9 = pneg %p2012_p8  ;;  %s23_s23 = ssub.s32 %s1948_s12, %s2028_s21 }
  0x11   : > { %s1820_s26 = scalar_lea.hbm %s2253_s1, 1024 }
  0x12   : > { %p2023_p11 = pnand %p1727_p9, %p2255_p1  ;;  %p1821_p12 = scmp.ne.s32.totalorder %s2253_s1, %s1820_s26 }
  0x13   : > { %p1827_p5 = scmp.lt.u32.totalorder %s1820_s26, %s2253_s1 }
  0x14   : > { %p1822_p13 = pneg %p2023_p11 }
  0x16   : > { %p1823_p0 = pnand %p1822_p13, %p1821_p12 }
  0x18   : > { %p1824_p3 = pneg %p1823_p0 }
  0x1a   : > { %p1829_p7 = pnand %p1827_p5, %p1824_p3 }
  0x1c   : > { %1832 = shalt.err (!%p1829_p7)
}
  0x1d   : > { %s1833_s3 = scalar_lea.vmem %s2016_s19, 1024  ;;  %p1841_p2 = scmp.lt.s32.totalorder %s2016_s19, %s2016_s19 }
  0x1e   : > { %p1834_p9 = scmp.ne.s32.totalorder %s2016_s19, %s1833_s3  ;;  %p1842_p6 = scmp.lt.s32.totalorder %s1833_s3, %s1833_s3 }
  0x20   : > { %p1836_p10 = pnand %p1834_p9, %p1822_p13  ;;  %p1843_p4 = por %p1842_p6, %p1841_p2 }
  0x22   : > { %p1837_p1 = pneg %p1836_p10 }
  0x24   : > { %p1844_p8 = pnand %p1843_p4, %p1837_p1 }
  0x26   : > { %1847 = shalt.err (!%p1844_p8)
}
  0x27   : > { %s1951_s4 = smov 64   ;;  %s1952_s5 = smov 4  }
  0x28   : > { %1730 = dma.hbm_to_vmem [thread:$0]  (!%p2023_p11), %s2253_s1, 1024, %s2016_s19, [#allocation6], %s1951_s4, %s1951_s4, %s1952_s5  }
  0x29   : > { %p24_p1 = scmp.eq.s32.totalorder %s23_s23, 0  ;;  %p33_p2 = scmp.ne.s32.totalorder %s1944_s11, %s1940_s10 }
  0x2a   : > { %p34_p4 = scmp.eq.s32.totalorder %s1948_s12, 0  ;;  %p1740_p6 = scmp.lt.s32.totalorder %s1948_s12, 2 }
  0x2b   : > { %s2062_s8 = scalar_select %p24_p1, %s1944_s11, %s26_s22  }
  0x2c   : > { %p35_p8 = por %p34_p4, %p33_p2  ;;  %p2262_p10 = scmp.eq.s32.totalorder %s1993_s13, 1 }
  0x2d   : > { %s123_s18 = sand.u32 1, %s1944_s11   ;;  %s1326_s20 = sshll.u32 %s1948_s12, 12 }
  0x2e   : > { %p2066_p12 = por %p2262_p10, %p33_p2  ;;  %s1210_s24 = sshll.u32 %s123_s18, 8 }
  0x2f   : > { %s2075_s27 = scalar_lea.hbm %s2252_s0, %s1326_s20  ;;  %s127_s19 = scalar_lea.vmem [#allocation2], %s1210_s24 }
  0x30   : > { %s134_s22 = sshll.u32 %s127_s19, 4  ;;  %p2077_p11 = pnand %p1740_p6, %p35_p8  ;;  %s2081_s22 = int_to_ptr.vmem [resolvable:$true] %s134_s22 }
  0x31   : > { %s2083_s28 = scalar_lea.sflag [#allocation3], %s123_s18  ;;  %s1848_s29 = scalar_lea.hbm %s2075_s27, 4096 }
  0x32   : > { %p1849_p13 = scmp.ne.s32.totalorder %s2075_s27, %s1848_s29  ;;  %p1850_p0 = pneg %p2077_p11 }
  0x33   : > { %s1853_s6 = scalar_lea.hbm %s2252_s0, 8192  ;;  %p1854_p7 = scmp.lt.u32.totalorder %s2075_s27, %s2252_s0 }
  0x34   : > { %p1851_p3 = pnand %p1850_p0, %p1849_p13  ;;  %p1855_p9 = scmp.lt.u32.totalorder %s1853_s6, %s1848_s29 }
  0x35   : > { %p1857_p2 = scmp.lt.u32.totalorder %s1848_s29, %s2075_s27 }
  0x36   : > { %p1852_p5 = pneg %p1851_p3  ;;  %p1856_p1 = por %p1855_p9, %p1854_p7 }
  0x38   : > { %p1858_p4 = por %p1857_p2, %p1856_p1 }
  0x3a   : > { %p1859_p6 = pnand %p1858_p4, %p1852_p5 }
  0x3c   : > { %1862 = shalt.err (!%p1859_p6)
}
  0x3d   : > { %s1863_s18 = scalar_lea.vmem %s2081_s22, 4096  ;;  %s1953_s24 = smov [#allocation2]  }
  0x3e   : > { %p1864_p8 = scmp.ne.s32.totalorder %s2081_s22, %s1863_s18  ;;  %s1868_s25 = sshll.u32 %s1953_s24, 4  ;;  %s1869_s25 = int_to_ptr.vmem [resolvable:$false] %s1868_s25 }
  0x3f   : > { %s1870_s26 = scalar_lea.vmem %s1869_s25, 8192  ;;  %p1871_p3 = scmp.lt.s32.totalorder %s2081_s22, %s1869_s25 }
  0x40   : > { %p1866_p10 = pnand %p1864_p8, %p1850_p0  ;;  %p1872_p7 = scmp.lt.s32.totalorder %s1870_s26, %s1863_s18 }
  0x42   : > { %p1867_p13 = pneg %p1866_p10  ;;  %p1873_p9 = por %p1872_p7, %p1871_p3 }
  0x44   : > { %p1874_p1 = pnand %p1873_p9, %p1867_p13 }
  0x46   : > { %1877 = shalt.err (!%p1874_p1)
}
  0x47   : > { %1734 = dma.hbm_to_vmem [thread:$0]  (!%p2077_p11), %s2075_s27, 4096, %s2081_s22, %s2083_s28, %s1951_s4, %s1951_s4, %s1952_s5  }
  0x48   : > { %p2265_p0 = scmp.ne.s32.totalorder %s2260_s17, 0 }
  0x49   : > { %s2117_s19 = sand.u32 (!%p2265_p0), 1, %s1940_s10   ;;  %p2266_p5 = scmp.ne.s32.totalorder (!%p2265_p0), %s2258_s15, 0 }
  0x4a   : > { %146 = sbr.rel (%p2265_p0) target bundleno = 406 (0x196), region = 28  ;;  %s1214_s29 = sshll.u32 (!%p2265_p0), %s2117_s19, 8 }
  0x4b   : > { %s149_s30 = scalar_lea.sflag (!%p2265_p0), [#allocation3], %s2117_s19  ;;  %s2123_s23 = scalar_lea.vmem (!%p2265_p0), [#allocation2], %s1214_s29 }
  0x51   : > { %1923 = dma.done.wait (%p2266_p5), %s149_s30, 4096  }
  0x52   : > { %1925 = vsyncadd (%p2266_p5), %s149_s30, 4294963200  ;;  %p2267_p11 = scmp.eq.s32.totalorder %s1993_s13, 0 }
  0x54   : > { %1927 = dma.done.wait (%p2267_p11), [#allocation6], 1024   ;;  %p2268_p2 = pmov %p2267_p11 }
  0x55   : > { %v1780_v0 = vld [vmem:[#allocation5] sm:$0xff]   ;;  %v1781_v1 = vld [vmem:[#allocation5 + $0x8] sm:$0xff]   ;;  %v1782_v2 = vld [vmem:[#allocation5 + $0x10] sm:$0xff]   ;;  %s2167_s15 = scalar_lea.vmem [#allocation7], %s1214_s29  ;;  %s1391_s17 = sshll.u32 %s1993_s13, 12 }
  0x56   : > { %1929 = vsyncadd (%p2268_p2), [#allocation6], 4294966272  ;;  %1623 = vmatprep.subr.bf16.mxu0 %v1780_v0  ;;  %1703 = vmatprep.subr.bf16.mxu1 %v1780_v0  ;;  %v1783_v3 = vld [vmem:[#allocation5 + $0x18] sm:$0xff]   ;;  %v1788_v4 = vld [vmem:[%s2123_s23] sm:$0xff]   ;;  %s1123_s4 = sshll.u32 %s2167_s15, 4  ;;  %s2202_s22 = scalar_lea.hbm %s2254_s2, %s1391_s17  ;;  %s2204_s4 = int_to_ptr.vmem [resolvable:$true] %s1123_s4 }
  0x57   : > { %1624 = vmatpush3.bf16.msra.mxu0 %v1780_v0  ;;  %1711 = vmatpush3.bf16.msra.mxu1 %v1780_v0  ;;  %v1789_v5 = vld [vmem:[%s2123_s23 + $0x80] sm:$0xff]   ;;  %v1785_v7 = vld [vmem:[#allocation5 + $0x28] sm:$0xff]   ;;  %v1786_v8 = vld [vmem:[#allocation5 + $0x30] sm:$0xff]   ;;  %s1110_s13 = scalar_lea.sflag [#allocation4], %s2117_s19  ;;  %s1878_s28 = scalar_lea.vmem %s2204_s4, 4096 }
  0x58   : > { %1625 = vmatprep.subr.bf16.mxu0 %v1781_v1  ;;  %1704 = vmatprep.subr.bf16.mxu1 %v1781_v1  ;;  %v1784_v6 = vld [vmem:[#allocation5 + $0x20] sm:$0xff]   ;;  %v1787_v9 = vld [vmem:[#allocation5 + $0x38] sm:$0xff]   ;;  %v1790_v10 = vld [vmem:[%s2123_s23 + $0x8] sm:$0xff]   ;;  %p1879_p4 = scmp.ne.s32.totalorder %s2204_s4, %s1878_s28  ;;  %s1954_s3 = smov [#allocation7]  }
  0x59   : > { %1639 = vmatprep.mubr.bf16.mxu0 %v1788_v4  ;;  %1671 = vmatprep.mubr.bf16.mxu1 %v1789_v5  ;;  %v1791_v11 = vld [vmem:[%s2123_s23 + $0x88] sm:$0xff]   ;;  %v1792_v12 = vld [vmem:[%s2123_s23 + $0x10] sm:$0xff]   ;;  %v1794_v14 = vld [vmem:[%s2123_s23 + $0x18] sm:$0xff]   ;;  %s1882_s6 = sshll.u32 %s1954_s3, 4  ;;  %s1883_s6 = int_to_ptr.vmem [resolvable:$false] %s1882_s6 }
  0x5a   : > { %v1793_v13 = vld [vmem:[%s2123_s23 + $0x90] sm:$0xff]   ;;  %v1795_v15 = vld [vmem:[%s2123_s23 + $0x98] sm:$0xff]   ;;  %v1796_v16 = vld [vmem:[%s2123_s23 + $0x20] sm:$0xff]   ;;  %p1880_p6 = pnand %p1879_p4, %p2066_p12  ;;  %s1884_s7 = scalar_lea.vmem %s1883_s6, 8192 }
  0x5b   : > { %1626 = vmatpush3.bf16.msra.mxu0 %v1781_v1  ;;  %1712 = vmatpush3.bf16.msra.mxu1 %v1781_v1  ;;  %v1797_v17 = vld [vmem:[%s2123_s23 + $0xa0] sm:$0xff]   ;;  %v1798_v18 = vld [vmem:[%s2123_s23 + $0x28] sm:$0xff]   ;;  %v1800_v20 = vld [vmem:[%s2123_s23 + $0x30] sm:$0xff]   ;;  %p1885_p10 = scmp.lt.s32.totalorder %s2204_s4, %s1883_s6  ;;  %p1886_p13 = scmp.lt.s32.totalorder %s1884_s7, %s1878_s28 }
  0x5c   : > { %1627 = vmatprep.subr.bf16.mxu0 %v1782_v2  ;;  %1705 = vmatprep.subr.bf16.mxu1 %v1782_v2  ;;  %v1799_v19 = vld [vmem:[%s2123_s23 + $0xa8] sm:$0xff]   ;;  %v1801_v21 = vld [vmem:[%s2123_s23 + $0xb0] sm:$0xff]   ;;  %v1802_v22 = vld [vmem:[%s2123_s23 + $0x38] sm:$0xff]   ;;  %p1881_p8 = pneg %p1880_p6 }
  0x5d   : > { %v1803_v23 = vld [vmem:[%s2123_s23 + $0xb8] sm:$0xff]   ;;  %v1804_v24 = vld [vmem:[%s2123_s23 + $0x40] sm:$0xff]   ;;  %v1806_v26 = vld [vmem:[%s2123_s23 + $0x48] sm:$0xff]   ;;  %p1887_p3 = por %p1886_p13, %p1885_p10 }
  0x5e   : > { %v1805_v25 = vld [vmem:[%s2123_s23 + $0xc0] sm:$0xff]   ;;  %v1807_v27 = vld [vmem:[%s2123_s23 + $0xc8] sm:$0xff]   ;;  %v1808_v28 = vld [vmem:[%s2123_s23 + $0x50] sm:$0xff]  }
  0x5f   : > { %1628 = vmatpush3.bf16.msra.mxu0 %v1782_v2  ;;  %1713 = vmatpush3.bf16.msra.mxu1 %v1782_v2  ;;  %v1809_v29 = vld [vmem:[%s2123_s23 + $0xd0] sm:$0xff]   ;;  %v1810_v30 = vld [vmem:[%s2123_s23 + $0x58] sm:$0xff]   ;;  %v1812_v32 = vld [vmem:[%s2123_s23 + $0x60] sm:$0xff]   ;;  %p1888_p7 = pnand %p1887_p3, %p1881_p8 }
  0x60   : > { %1629 = vmatprep.subr.bf16.mxu0 %v1783_v3  ;;  %1706 = vmatprep.subr.bf16.mxu1 %v1783_v3  ;;  %v1811_v31 = vld [vmem:[%s2123_s23 + $0xd8] sm:$0xff]   ;;  %v1813_v33 = vld [vmem:[%s2123_s23 + $0xe0] sm:$0xff]   ;;  %v1814_v34 = vld [vmem:[%s2123_s23 + $0x68] sm:$0xff]  }
  0x61   : > { %v1815_v35 = vld [vmem:[%s2123_s23 + $0xe8] sm:$0xff]   ;;  %v1816_v36 = vld [vmem:[%s2123_s23 + $0x70] sm:$0xff]   ;;  %v1818_v38 = vld [vmem:[%s2123_s23 + $0x78] sm:$0xff]  }
  0x62   : > { %v1817_v37 = vld [vmem:[%s2123_s23 + $0xf0] sm:$0xff]   ;;  %v1819_v39 = vld [vmem:[%s2123_s23 + $0xf8] sm:$0xff]  }
  0x63   : > { %1630 = vmatpush3.bf16.msra.mxu0 %v1783_v3  ;;  %1714 = vmatpush3.bf16.msra.mxu1 %v1783_v3 }
  0x64   : > { %1631 = vmatprep.subr.bf16.mxu0 %v1784_v6  ;;  %1707 = vmatprep.subr.bf16.mxu1 %v1784_v6 }
  0x67   : > { %1632 = vmatpush3.bf16.msra.mxu0 %v1784_v6  ;;  %1715 = vmatpush3.bf16.msra.mxu1 %v1784_v6 }
  0x68   : > { %1633 = vmatprep.subr.bf16.mxu0 %v1785_v7  ;;  %1708 = vmatprep.subr.bf16.mxu1 %v1785_v7 }
  0x6b   : > { %1634 = vmatpush3.bf16.msra.mxu0 %v1785_v7  ;;  %1716 = vmatpush3.bf16.msra.mxu1 %v1785_v7 }
  0x6c   : > { %1635 = vmatprep.subr.bf16.mxu0 %v1786_v8  ;;  %1709 = vmatprep.subr.bf16.mxu1 %v1786_v8 }
  0x6f   : > { %1636 = vmatpush3.bf16.msra.mxu0 %v1786_v8  ;;  %1717 = vmatpush3.bf16.msra.mxu1 %v1786_v8 }
  0x70   : > { %1637 = vmatprep.subr.bf16.mxu0 %v1787_v9  ;;  %1710 = vmatprep.subr.bf16.mxu1 %v1787_v9 }
  0x73   : > { %1638 = vmatpush3.bf16.msra.mxu0 %v1787_v9  ;;  %1718 = vmatpush3.bf16.msra.mxu1 %v1787_v9 }
  0x76   : > { %1640 = vmatmul.mubr.bf16.vlgmr.msra.gmra.mrb[0].mxu0 %v1790_v10  ;;  %1672 = vmatmul.mubr.bf16.vlgmr.msra.gmra.mrb[0].mxu1 %v1791_v11 }
  0x77   : > { %1643 = vmatprep.mubr.bf16.mxu0 %v1792_v12  ;;  %1675 = vmatprep.mubr.bf16.mxu1 %v1793_v13 }
  0x7e   : > { %1644 = vmatmul.mubr.bf16.gmra.mrb[4].mxu0 %v1794_v14  ;;  %1676 = vmatmul.mubr.bf16.gmra.mrb[4].mxu1 %v1795_v15 }
  0x7f   : > { %1647 = vmatprep.mubr.bf16.mxu0 %v1796_v16  ;;  %1679 = vmatprep.mubr.bf16.mxu1 %v1797_v17 }
  0x86   : > { %1648 = vmatmul.mubr.bf16.gmra.mrb[8].mxu0 %v1798_v18  ;;  %1680 = vmatmul.mubr.bf16.gmra.mrb[8].mxu1 %v1799_v19 }
  0x87   : > { %1651 = vmatprep.mubr.bf16.mxu0 %v1800_v20  ;;  %1683 = vmatprep.mubr.bf16.mxu1 %v1801_v21 }
  0x8e   : > { %1652 = vmatmul.mubr.bf16.gmra.mrb[12].mxu0 %v1802_v22  ;;  %1684 = vmatmul.mubr.bf16.gmra.mrb[12].mxu1 %v1803_v23 }
  0x8f   : > { %1655 = vmatprep.mubr.bf16.mxu0 %v1804_v24  ;;  %1687 = vmatprep.mubr.bf16.mxu1 %v1805_v25 }
  0x96   : > { %1656 = vmatmul.mubr.bf16.gmra.mrb[16].mxu0 %v1806_v26  ;;  %1688 = vmatmul.mubr.bf16.gmra.mrb[16].mxu1 %v1807_v27 }
  0x97   : > { %1659 = vmatprep.mubr.bf16.mxu0 %v1808_v28  ;;  %1691 = vmatprep.mubr.bf16.mxu1 %v1809_v29 }
  0x9e   : > { %1660 = vmatmul.mubr.bf16.gmra.mrb[20].mxu0 %v1810_v30  ;;  %1692 = vmatmul.mubr.bf16.gmra.mrb[20].mxu1 %v1811_v31 }
  0x9f   : > { %1663 = vmatprep.mubr.bf16.mxu0 %v1812_v32  ;;  %1695 = vmatprep.mubr.bf16.mxu1 %v1813_v33 }
  0xa6   : > { %1664 = vmatmul.mubr.bf16.gmra.mrb[24].mxu0 %v1814_v34  ;;  %1696 = vmatmul.mubr.bf16.gmra.mrb[24].mxu1 %v1815_v35 }
  0xa7   : > { %1667 = vmatprep.mubr.bf16.mxu0 %v1816_v36  ;;  %1699 = vmatprep.mubr.bf16.mxu1 %v1817_v37 }
  0xae   : > { %1668 = vmatmul.mubr.bf16.gmra.mrb[28].mxu0 %v1818_v38  ;;  %1700 = vmatmul.mubr.bf16.gmra.mrb[28].mxu1 %v1819_v39 }
 0x149   : > { %v1641_v40 = vpop.f32.mrb[0].mxu0  ;;  %v1673_v41 = vpop.f32.mrb[0].mxu1 }
 0x14a   : > { %v534_v42 = vpop.f32.mrb[1].mxu0  ;;  %v662_v43 = vpop.f32.mrb[1].mxu1 }
 0x14b   : > { %v1642_v44 = vpop.f32.mrb[2].mxu0  ;;  %v1674_v45 = vpop.f32.mrb[2].mxu1 }
 0x14c   : > { %v1400_v46 = vpack.c.bf16 %v1642_v44, %v1641_v40  ;;  %v1480_v47 = vpack.c.bf16 %v1674_v45, %v1673_v41  ;;  %v537_v48 = vpop.f32.mrb[3].mxu0  ;;  %v665_v49 = vpop.f32.mrb[3].mxu1 }
 0x14d   : > { %v1395_v50 = vpack.c.bf16 %v537_v48, %v534_v42  ;;  %v1475_v51 = vpack.c.bf16 %v665_v49, %v662_v43 }
 0x14e   : > { %1552 = vst [vmem:[%s2167_s15 + $0x8] sm:$0xff] %v1400_v46   ;;  %1568 = vst [vmem:[%s2167_s15 + $0x88] sm:$0xff] %v1480_v47  }
 0x14f   : > { %1396 = vst [vmem:[%s2167_s15] sm:$0xff] %v1395_v50   ;;  %1567 = vst [vmem:[%s2167_s15 + $0x80] sm:$0xff] %v1475_v51  }
 0x151   : > { %v1645_v52 = vpop.f32.mrb[4].mxu0  ;;  %v1677_v53 = vpop.f32.mrb[4].mxu1 }
 0x152   : > { %v550_v54 = vpop.f32.mrb[5].mxu0  ;;  %v678_v55 = vpop.f32.mrb[5].mxu1 }
 0x153   : > { %v1646_v56 = vpop.f32.mrb[6].mxu0  ;;  %v1678_v57 = vpop.f32.mrb[6].mxu1 }
 0x154   : > { %v1410_v58 = vpack.c.bf16 %v1646_v56, %v1645_v52  ;;  %v1490_v59 = vpack.c.bf16 %v1678_v57, %v1677_v53  ;;  %v553_v60 = vpop.f32.mrb[7].mxu0  ;;  %v681_v61 = vpop.f32.mrb[7].mxu1 }
 0x155   : > { %v1405_v62 = vpack.c.bf16 %v553_v60, %v550_v54  ;;  %v1485_v63 = vpack.c.bf16 %v681_v61, %v678_v55 }
 0x156   : > { %1554 = vst [vmem:[%s2167_s15 + $0x18] sm:$0xff] %v1410_v58   ;;  %1570 = vst [vmem:[%s2167_s15 + $0x98] sm:$0xff] %v1490_v59  }
 0x157   : > { %1553 = vst [vmem:[%s2167_s15 + $0x10] sm:$0xff] %v1405_v62   ;;  %1569 = vst [vmem:[%s2167_s15 + $0x90] sm:$0xff] %v1485_v63  }
 0x159   : > { %v1649_v0 = vpop.f32.mrb[8].mxu0  ;;  %v1681_v1 = vpop.f32.mrb[8].mxu1 }
 0x15a   : > { %v566_v2 = vpop.f32.mrb[9].mxu0  ;;  %v694_v3 = vpop.f32.mrb[9].mxu1 }
 0x15b   : > { %v1650_v4 = vpop.f32.mrb[10].mxu0  ;;  %v1682_v5 = vpop.f32.mrb[10].mxu1 }
 0x15c   : > { %v1420_v6 = vpack.c.bf16 %v1650_v4, %v1649_v0  ;;  %v1500_v7 = vpack.c.bf16 %v1682_v5, %v1681_v1  ;;  %v569_v8 = vpop.f32.mrb[11].mxu0  ;;  %v697_v9 = vpop.f32.mrb[11].mxu1 }
 0x15d   : > { %v1415_v10 = vpack.c.bf16 %v569_v8, %v566_v2  ;;  %v1495_v11 = vpack.c.bf16 %v697_v9, %v694_v3 }
 0x15e   : > { %1556 = vst [vmem:[%s2167_s15 + $0x28] sm:$0xff] %v1420_v6   ;;  %1572 = vst [vmem:[%s2167_s15 + $0xa8] sm:$0xff] %v1500_v7  }
 0x15f   : > { %1555 = vst [vmem:[%s2167_s15 + $0x20] sm:$0xff] %v1415_v10   ;;  %1571 = vst [vmem:[%s2167_s15 + $0xa0] sm:$0xff] %v1495_v11  }
 0x161   : > { %v1653_v12 = vpop.f32.mrb[12].mxu0  ;;  %v1685_v13 = vpop.f32.mrb[12].mxu1 }
 0x162   : > { %v582_v14 = vpop.f32.mrb[13].mxu0  ;;  %v710_v15 = vpop.f32.mrb[13].mxu1 }
 0x163   : > { %v1654_v16 = vpop.f32.mrb[14].mxu0  ;;  %v1686_v17 = vpop.f32.mrb[14].mxu1 }
 0x164   : > { %v1430_v18 = vpack.c.bf16 %v1654_v16, %v1653_v12  ;;  %v1510_v19 = vpack.c.bf16 %v1686_v17, %v1685_v13  ;;  %v585_v20 = vpop.f32.mrb[15].mxu0  ;;  %v713_v21 = vpop.f32.mrb[15].mxu1 }
 0x165   : > { %v1425_v22 = vpack.c.bf16 %v585_v20, %v582_v14  ;;  %v1505_v23 = vpack.c.bf16 %v713_v21, %v710_v15 }
 0x166   : > { %1558 = vst [vmem:[%s2167_s15 + $0x38] sm:$0xff] %v1430_v18   ;;  %1574 = vst [vmem:[%s2167_s15 + $0xb8] sm:$0xff] %v1510_v19  }
 0x167   : > { %1557 = vst [vmem:[%s2167_s15 + $0x30] sm:$0xff] %v1425_v22   ;;  %1573 = vst [vmem:[%s2167_s15 + $0xb0] sm:$0xff] %v1505_v23  }
 0x169   : > { %v1657_v24 = vpop.f32.mrb[16].mxu0  ;;  %v1689_v25 = vpop.f32.mrb[16].mxu1 }
 0x16a   : > { %v598_v26 = vpop.f32.mrb[17].mxu0  ;;  %v726_v27 = vpop.f32.mrb[17].mxu1 }
 0x16b   : > { %v1658_v28 = vpop.f32.mrb[18].mxu0  ;;  %v1690_v29 = vpop.f32.mrb[18].mxu1 }
 0x16c   : > { %v1440_v30 = vpack.c.bf16 %v1658_v28, %v1657_v24  ;;  %v1520_v31 = vpack.c.bf16 %v1690_v29, %v1689_v25  ;;  %v601_v32 = vpop.f32.mrb[19].mxu0  ;;  %v729_v33 = vpop.f32.mrb[19].mxu1 }
 0x16d   : > { %v1435_v34 = vpack.c.bf16 %v601_v32, %v598_v26  ;;  %v1515_v35 = vpack.c.bf16 %v729_v33, %v726_v27 }
 0x16e   : > { %1560 = vst [vmem:[%s2167_s15 + $0x48] sm:$0xff] %v1440_v30   ;;  %1576 = vst [vmem:[%s2167_s15 + $0xc8] sm:$0xff] %v1520_v31  }
 0x16f   : > { %1559 = vst [vmem:[%s2167_s15 + $0x40] sm:$0xff] %v1435_v34   ;;  %1575 = vst [vmem:[%s2167_s15 + $0xc0] sm:$0xff] %v1515_v35  }
 0x171   : > { %v1661_v36 = vpop.f32.mrb[20].mxu0  ;;  %v1693_v37 = vpop.f32.mrb[20].mxu1 }
 0x172   : > { %v614_v38 = vpop.f32.mrb[21].mxu0  ;;  %v742_v39 = vpop.f32.mrb[21].mxu1 }
 0x173   : > { %v1662_v40 = vpop.f32.mrb[22].mxu0  ;;  %v1694_v41 = vpop.f32.mrb[22].mxu1 }
 0x174   : > { %v1450_v42 = vpack.c.bf16 %v1662_v40, %v1661_v36  ;;  %v1530_v43 = vpack.c.bf16 %v1694_v41, %v1693_v37  ;;  %v617_v44 = vpop.f32.mrb[23].mxu0  ;;  %v745_v45 = vpop.f32.mrb[23].mxu1 }
 0x175   : > { %v1445_v46 = vpack.c.bf16 %v617_v44, %v614_v38  ;;  %v1525_v47 = vpack.c.bf16 %v745_v45, %v742_v39 }
 0x176   : > { %1562 = vst [vmem:[%s2167_s15 + $0x58] sm:$0xff] %v1450_v42   ;;  %1578 = vst [vmem:[%s2167_s15 + $0xd8] sm:$0xff] %v1530_v43  }
 0x177   : > { %1561 = vst [vmem:[%s2167_s15 + $0x50] sm:$0xff] %v1445_v46   ;;  %1577 = vst [vmem:[%s2167_s15 + $0xd0] sm:$0xff] %v1525_v47  }
 0x179   : > { %v1665_v48 = vpop.f32.mrb[24].mxu0  ;;  %v1697_v49 = vpop.f32.mrb[24].mxu1 }
 0x17a   : > { %v630_v50 = vpop.f32.mrb[25].mxu0  ;;  %v758_v51 = vpop.f32.mrb[25].mxu1 }
 0x17b   : > { %v1666_v52 = vpop.f32.mrb[26].mxu0  ;;  %v1698_v53 = vpop.f32.mrb[26].mxu1 }
 0x17c   : > { %v1460_v54 = vpack.c.bf16 %v1666_v52, %v1665_v48  ;;  %v1540_v55 = vpack.c.bf16 %v1698_v53, %v1697_v49  ;;  %v633_v56 = vpop.f32.mrb[27].mxu0  ;;  %v761_v57 = vpop.f32.mrb[27].mxu1 }
 0x17d   : > { %v1455_v58 = vpack.c.bf16 %v633_v56, %v630_v50  ;;  %v1535_v59 = vpack.c.bf16 %v761_v57, %v758_v51 }
 0x17e   : > { %1564 = vst [vmem:[%s2167_s15 + $0x68] sm:$0xff] %v1460_v54   ;;  %1580 = vst [vmem:[%s2167_s15 + $0xe8] sm:$0xff] %v1540_v55  }
 0x17f   : > { %1563 = vst [vmem:[%s2167_s15 + $0x60] sm:$0xff] %v1455_v58   ;;  %1579 = vst [vmem:[%s2167_s15 + $0xe0] sm:$0xff] %v1535_v59  }
 0x181   : > { %v1669_v60 = vpop.f32.mrb[28].mxu0  ;;  %v1701_v61 = vpop.f32.mrb[28].mxu1 }
 0x182   : > { %v646_v62 = vpop.f32.mrb[29].mxu0  ;;  %v774_v63 = vpop.f32.mrb[29].mxu1 }
 0x183   : > { %v1670_v0 = vpop.f32.mrb[30].mxu0  ;;  %v1702_v1 = vpop.f32.mrb[30].mxu1 }
 0x184   : > { %v1470_v2 = vpack.c.bf16 %v1670_v0, %v1669_v60  ;;  %v1550_v3 = vpack.c.bf16 %v1702_v1, %v1701_v61  ;;  %v649_v4 = vpop.f32.mrb[31].mxu0  ;;  %v777_v5 = vpop.f32.mrb[31].mxu1 }
 0x185   : > { %v1465_v6 = vpack.c.bf16 %v649_v4, %v646_v62  ;;  %v1545_v7 = vpack.c.bf16 %v777_v5, %v774_v63 }
 0x186   : > { %1566 = vst [vmem:[%s2167_s15 + $0x78] sm:$0xff] %v1470_v2   ;;  %1582 = vst [vmem:[%s2167_s15 + $0xf8] sm:$0xff] %v1550_v3  }
 0x187   : > { %1565 = vst [vmem:[%s2167_s15 + $0x70] sm:$0xff] %v1465_v6   ;;  %1581 = vst [vmem:[%s2167_s15 + $0xf0] sm:$0xff] %v1545_v7  }
 0x188   : > { %1891 = shalt.err (!%p1888_p7)
}
 0x189   : > { %s1892_s20 = scalar_lea.hbm %s2202_s22, 4096  ;;  %s1896_s25 = scalar_lea.hbm %s2254_s2, 8192 }
 0x18a   : > { %p1893_p9 = scmp.ne.s32.totalorder %s2202_s22, %s1892_s20  ;;  %p1897_p5 = scmp.lt.u32.totalorder %s2202_s22, %s2254_s2 }
 0x18b   : > { %p1898_p11 = scmp.lt.u32.totalorder %s1896_s25, %s1892_s20  ;;  %p1900_p4 = scmp.lt.u32.totalorder %s1892_s20, %s2202_s22 }
 0x18c   : > { %p1894_p1 = pnand %p1893_p9, %p2066_p12 }
 0x18d   : > { %p1899_p2 = por %p1898_p11, %p1897_p5 }
 0x18e   : > { %p1895_p0 = pneg %p1894_p1 }
 0x18f   : > { %p1901_p6 = por %p1900_p4, %p1899_p2 }
 0x191   : > { %p1902_p8 = pnand %p1901_p6, %p1895_p0 }
 0x193   : > { %1905 = shalt.err (!%p1902_p8)
}
 0x194   : > { %s1955_s30 = smov 64   ;;  %s1956_s23 = smov 4  }
 0x195   : > { %1725 = dma.vmem_to_hbm [thread:$0]  (%p2066_p12), %s2204_s4, 4096, %s2202_s22, %s1110_s13, %s1955_s30, %s1955_s30, %s1956_s23  }
 0x196 PF: > { %s1138_s15 = sand.u32 1, %s1936_s9   ;;  %p2269_p10 = scmp.ne.s32.totalorder %s2259_s16, 0 }
 0x197   : > { %p2270_p13 = scmp.ge.s32.totalorder %s1948_s12, 2  ;;  %s1139_s17 = scalar_lea.sflag [#allocation4], %s1138_s15 }
 0x199   : > { %p1736_p3 = pnand %p2270_p13, %p2269_p10 }
 0x19b   : > { %1931 = dma.done.wait (!%p1736_p3), %s1139_s17, 4096  }
 0x19c   : > { %1933 = vsyncadd (!%p1736_p3), %s1139_s17, 4294963200  ;;  %p16_p7 = scmp.ge.s32.totalorder %s2028_s21, 4   ;;  %s2271_s9 = smov %s1940_s10 }
 0x19d   : > { %s2272_s10 = smov %s1944_s11  ;;  %s2273_s11 = smov %s2062_s8 }
 0x19e   : > { %s2274_s12 = smov %s2028_s21  ;;  %18 = sbr.rel (!%p16_p7) target bundleno = 6 (0x6), region = 77 }
 0x1a5   :  { %1144 = vsyncpa [#allocation3], 1 }
 0x1a6   :  { %1146 = vsyncpa [#allocation3 + $0x1], 1 }
 0x1a7   :  { %1147 = vsyncpa [#allocation6], 1 }
 0x1a8   :  { %1148 = vsyncpa [#allocation4], 1 }
 0x1a9   :  { %1150 = vsyncpa [#allocation4 + $0x1], 1 }

</bundles_post_ra>
